<compile_context>
chip_gen: v6e
topology: v6e:2x2x1
jax: 0.10.0
libtpu: 0.0.40
codegen_flags: <defaults>
</compile_context>

<pallas_src>
import jax
import jax.numpy as jnp
from jax.experimental import pallas as pl
from jax.experimental.pallas import tpu as pltpu


# ---------------------------------------------------------------------------
# Kernel factory: one grid step = (batch element b, layer l).
# ---------------------------------------------------------------------------
def _make_kernel(num_heads):
    H = num_heads

    def kernel(x_ref, w_in_ref, b_in_ref, w_out_ref, b_out_ref,
               w1_ref, b1_ref, w2_ref, b2_ref, o_ref, act_ref):
        L, E = x_ref.shape
        hd = E // H
        layer = pl.program_id(1)

        # Layer 0 of each batch element: load input into the VMEM activation carry.
        @pl.when(layer == 0)
        def _():
            act_ref[...] = x_ref[...].astype(jnp.float32)

        x = act_ref[...]                                              # (L, E) f32

        # ---- QKV in-projection: ONE lane-dense (L,E)@(E,3E) matmul -------------
        # (1/sqrt(hd) already folded into the Q columns / Q bias host-side)
        qkv = jnp.dot(x.astype(jnp.bfloat16), w_in_ref[...],
                      preferred_element_type=jnp.float32) + b_in_ref[...]   # (L, 3E)
        q, k, v = qkv[:, :E], qkv[:, E:2 * E], qkv[:, 2 * E:]

        # Head-leading (H, L, hd) via static lane slices (no in-kernel transpose).
        def split_heads(m):
            return jnp.stack([m[:, h * hd:(h + 1) * hd] for h in range(H)], axis=0)

        qh = split_heads(q).astype(jnp.bfloat16)
        kh = split_heads(k).astype(jnp.bfloat16)
        vh = split_heads(v).astype(jnp.bfloat16)

        # ---- attention: all heads in one batched contraction --------------------
        s = jnp.einsum('hqd,hkd->hqk', qh, kh,
                       preferred_element_type=jnp.float32)            # (H, L, L)
        s = s - jnp.max(s, axis=-1, keepdims=True)
        p = jnp.exp(s)
        p = p * pl.reciprocal(jnp.sum(p, axis=-1, keepdims=True), approx=True)
        o = jnp.einsum('hqk,hkd->hqd', p.astype(jnp.bfloat16), vh,
                       preferred_element_type=jnp.float32)            # (H, L, hd)

        # ---- merge heads -> (L,E); single (L,E)@(E,E) out-proj (2x folded) -----
        o_m = jnp.concatenate([o[h] for h in range(H)], axis=-1)      # (L, E)
        x1 = jnp.dot(o_m.astype(jnp.bfloat16), w_out_ref[...],
                     preferred_element_type=jnp.float32) + b_out_ref[...]   # (L, E)

        # ---- feed-forward (eval-mode 2x residual folded into W2/b2) -------------
        h1 = jnp.maximum(
            jnp.dot(x1.astype(jnp.bfloat16), w1_ref[...],
                    preferred_element_type=jnp.float32) + b1_ref[...], 0.0)  # (L, ff)
        x_new = jnp.dot(h1.astype(jnp.bfloat16), w2_ref[...],
                        preferred_element_type=jnp.float32) + b2_ref[...]    # (L, E)

        act_ref[...] = x_new

        @pl.when(layer == pl.num_programs(1) - 1)
        def _():
            o_ref[...] = x_new.astype(o_ref.dtype)

    return kernel


# ---------------------------------------------------------------------------
# Wrapper: single pallas_call, grid=(batch, layers), weights streamed per layer.
# ---------------------------------------------------------------------------
def transformer_encoder(x_lbe, kernel_params, num_heads):
    """x_lbe: (seq, batch, embed) — PyTorch nn.MultiheadAttention default layout."""
    (w_in, b_in, w_out, b_out, w1, b1, w2, b2) = kernel_params
    num_layers, E, three_e = w_in.shape
    ff = w1.shape[-1]

    # One-time, tiny (L,B,E)<->(B,L,E) layout change; accepted consciously.
    x_ble = jnp.transpose(x_lbe, (1, 0, 2))              # (B, L, E)
    B, L, _ = x_ble.shape

    kernel = _make_kernel(num_heads)

    out_ble = pl.pallas_call(
        kernel,
        out_shape=jax.ShapeDtypeStruct((B, L, E), x_ble.dtype),
        grid=(B, num_layers),
        in_specs=[
            pl.BlockSpec((None, L, E), lambda b, l: (b, 0, 0)),        # x (batch-sliced)
            pl.BlockSpec((None, E, three_e), lambda b, l: (l, 0, 0)),  # W_in  (E, 3E) bf16
            pl.BlockSpec((None, 1, three_e), lambda b, l: (l, 0, 0)),  # b_in  (1, 3E) f32
            pl.BlockSpec((None, E, E), lambda b, l: (l, 0, 0)),        # W_out (E, E)  bf16
            pl.BlockSpec((None, 1, E), lambda b, l: (l, 0, 0)),        # b_out (1, E)  f32
            pl.BlockSpec((None, E, ff), lambda b, l: (l, 0, 0)),       # W1    (E, ff) bf16
            pl.BlockSpec((None, 1, ff), lambda b, l: (l, 0, 0)),       # b1    (1, ff) f32
            pl.BlockSpec((None, ff, E), lambda b, l: (l, 0, 0)),       # W2    (ff, E) bf16
            pl.BlockSpec((None, 1, E), lambda b, l: (l, 0, 0)),        # b2    (1, E)  f32
        ],
        out_specs=pl.BlockSpec((None, L, E), lambda b, l: (b, 0, 0)),
        scratch_shapes=[pltpu.VMEM((L, E), jnp.float32)],              # activation carry
        compiler_params=pltpu.CompilerParams(
            dimension_semantics=("parallel", "arbitrary"),
            vmem_limit_bytes=32 * 1024 * 1024),
    )(x_ble, w_in, b_in, w_out, b_out, w1, b1, w2, b2)

    return jnp.transpose(out_ble, (1, 0, 2))              # back to (L, B, E)


# ---------------------------------------------------------------------------
# Raw (PyTorch-shaped) parameters + host-side transform for the kernel.
# ---------------------------------------------------------------------------
def init_raw_params(key, input_dim, num_heads, ff_dim, num_layers):
    params = []
    for _ in range(num_layers):
        key, *ks = jax.random.split(key, 9)
        E, F = input_dim, ff_dim
        w_in = jax.random.normal(ks[0], (3 * E, E), jnp.float32) * 0.05   # in_proj_weight
        b_in = jax.random.normal(ks[1], (3 * E,), jnp.float32) * 0.05
        w_out = jax.random.normal(ks[2], (E, E), jnp.float32) * 0.05      # out_proj
        b_out = jax.random.normal(ks[3], (E,), jnp.float32) * 0.05
        w1 = jax.random.normal(ks[4], (F, E), jnp.float32) * 0.05         # Linear(E, ff)
        b1 = jax.random.normal(ks[5], (F,), jnp.float32) * 0.05
        w2 = jax.random.normal(ks[6], (E, F), jnp.float32) * 0.05         # Linear(ff, E)
        b2 = jax.random.normal(ks[7], (E,), jnp.float32) * 0.05
        params.append((w_in, b_in, w_out, b_out, w1, b1, w2, b2))
    return params


def prepare_kernel_params(raw_params, num_heads):
    """Transpose to (in,out), fold 1/sqrt(hd) into the Q columns and the eval-mode
    2x residual doubling into (W_out,b_out)/(W2,b2), cast weights to bf16, and
    stack all layers on a leading axis for per-layer streaming."""
    E = raw_params[0][0].shape[1]
    hd = E // num_heads
    scale = 1.0 / (hd ** 0.5)

    W_IN, B_IN, W_OUT, B_OUT, W1, B1, W2, B2 = ([] for _ in range(8))
    for (w_in, b_in, w_out, b_out, w1, b1, w2, b2) in raw_params:
        w_in_t = w_in.T                                   # (E, 3E): cols [q | k | v]
        w_in_t = w_in_t.at[:, :E].multiply(scale)         # fold 1/sqrt(hd) into Q
        b_in_s = b_in.at[:E].multiply(scale)

        W_IN.append(w_in_t.astype(jnp.bfloat16))
        B_IN.append(b_in_s[None, :])                      # (1, 3E) f32
        W_OUT.append((w_out.T * 2.0).astype(jnp.bfloat16))   # (E, E), fold 2x
        B_OUT.append((b_out * 2.0)[None, :])
        W1.append(w1.T.astype(jnp.bfloat16))                 # (E, ff)
        B1.append(b1[None, :])
        W2.append((w2.T * 2.0).astype(jnp.bfloat16))         # (ff, E), fold 2x
        B2.append((b2 * 2.0)[None, :])

    stack = lambda xs: jnp.stack(xs, axis=0)
    return (stack(W_IN), stack(B_IN), stack(W_OUT), stack(B_OUT),
            stack(W1), stack(B1), stack(W2), stack(B2))


# ---------------------------------------------------------------------------
# Pure-JAX reference (mirrors the PyTorch forward in eval mode, raw f32 params).
# ---------------------------------------------------------------------------
def reference(x_lbe, raw_params, *, num_heads):
    x = jnp.transpose(x_lbe, (1, 0, 2))                  # (B, L, E)
    B, L, E = x.shape
    hd = E // num_heads
    for (w_in, b_in, w_out, b_out, w1, b1, w2, b2) in raw_params:
        qkv = x @ w_in.T + b_in                          # (B, L, 3E)
        q, k, v = qkv[..., :E], qkv[..., E:2 * E], qkv[..., 2 * E:]
        q = q.reshape(B, L, num_heads, hd).transpose(0, 2, 1, 3) / (hd ** 0.5)
        k = k.reshape(B, L, num_heads, hd).transpose(0, 2, 1, 3)
        v = v.reshape(B, L, num_heads, hd).transpose(0, 2, 1, 3)
        s = jnp.einsum("bhqd,bhkd->bhqk", q, k)
        p = jax.nn.softmax(s, axis=-1)
        o = jnp.einsum("bhqk,bhkd->bhqd", p, v).transpose(0, 2, 1, 3).reshape(B, L, E)
        a = o @ w_out.T + b_out
        x = a * 2.0                                      # a + dropout(a), eval mode
        h1 = jnp.maximum(x @ w1.T + b1, 0.0)
        f = h1 @ w2.T + b2
        x = f * 2.0                                      # f + dropout(f), eval mode
    return jnp.transpose(x, (1, 0, 2))


if __name__ == "__main__":
    SEQ, BATCH, INPUT_DIM, NUM_HEADS, FF_DIM, NUM_LAYERS = 8, 2, 32, 4, 64, 2

    key = jax.random.PRNGKey(0)
    kx, kp = jax.random.split(key)
    x = jax.random.normal(kx, (SEQ, BATCH, INPUT_DIM), jnp.float32)

    raw_params = init_raw_params(kp, INPUT_DIM, NUM_HEADS, FF_DIM, NUM_LAYERS)
    kernel_params = prepare_kernel_params(raw_params, NUM_HEADS)

    out = transformer_encoder(x, kernel_params, NUM_HEADS)
    out = jax.block_until_ready(out)

    ref = reference(x, raw_params, num_heads=NUM_HEADS)
    assert out.shape == (SEQ, BATCH, INPUT_DIM), out.shape
    assert bool(jnp.allclose(out, ref, rtol=2e-2, atol=2e-2)), "mismatch vs reference"

    print("KERNEL_OK")
</pallas_src>

<mosaic_0001>
module attributes {stable_mosaic.version = 11 : i64} {
  func.func @kernel(%arg0: i32, %arg1: i32, %arg2: memref<1x8x32xf32, #tpu.memory_space<vmem>>, %arg3: memref<1x32x96xbf16, #tpu.memory_space<vmem>>, %arg4: memref<1x1x96xf32, #tpu.memory_space<vmem>>, %arg5: memref<1x32x32xbf16, #tpu.memory_space<vmem>>, %arg6: memref<1x1x32xf32, #tpu.memory_space<vmem>>, %arg7: memref<1x32x64xbf16, #tpu.memory_space<vmem>>, %arg8: memref<1x1x64xf32, #tpu.memory_space<vmem>>, %arg9: memref<1x64x32xbf16, #tpu.memory_space<vmem>>, %arg10: memref<1x1x32xf32, #tpu.memory_space<vmem>>, %arg11: memref<1x8x32xf32, #tpu.memory_space<vmem>>, %arg12: memref<8x32xf32, #tpu.memory_space<vmem>>) attributes {dimension_semantics = [#tpu.dimension_semantics<parallel>, #tpu.dimension_semantics<arbitrary>], iteration_bounds = array<i64: 2, 2>, scalar_prefetch = 0 : i64, scratch_operands = 1 : i64, tpu.core_type = #tpu.core_type<tc>, window_params = [{transform_indices = @transform_0, window_bounds = array<i64: 1, 8, 32>}, {transform_indices = @transform_1, window_bounds = array<i64: 1, 32, 96>}, {transform_indices = @transform_2, window_bounds = array<i64: 1, 1, 96>}, {transform_indices = @transform_3, window_bounds = array<i64: 1, 32, 32>}, {transform_indices = @transform_4, window_bounds = array<i64: 1, 1, 32>}, {transform_indices = @transform_5, window_bounds = array<i64: 1, 32, 64>}, {transform_indices = @transform_6, window_bounds = array<i64: 1, 1, 64>}, {transform_indices = @transform_7, window_bounds = array<i64: 1, 64, 32>}, {transform_indices = @transform_8, window_bounds = array<i64: 1, 1, 32>}, {transform_indices = @transform_9, window_bounds = array<i64: 1, 8, 32>}]} {
    %c0_i32 = arith.constant 0 : i32
    %0 = arith.cmpi eq, %arg1, %c0_i32 : i32
    %1 = arith.extui %0 : i1 to i32
    %c0_i32_0 = arith.constant 0 : i32
    %2 = arith.cmpi ne, %1, %c0_i32_0 : i32
    scf.if %2 {
      %c0_37 = arith.constant 0 : index
      %c0_38 = arith.constant 0 : index
      %c0_39 = arith.constant 0 : index
      %97 = vector.load %arg2[%c0_37, %c0_38, %c0_39] : memref<1x8x32xf32, #tpu.memory_space<vmem>>, vector<1x8x32xf32>
      %98 = vector.shape_cast %97 : vector<1x8x32xf32> to vector<8x32xf32>
      %c0_40 = arith.constant 0 : index
      %c0_41 = arith.constant 0 : index
      %99 = vector.load %arg12[%c0_40, %c0_41] : memref<8x32xf32, #tpu.memory_space<vmem>>, vector<8x32xf32>
      tpu.vector_store %arg12[%c0_40, %c0_41], %98 {strides = array<i32>} : memref<8x32xf32, #tpu.memory_space<vmem>>, vector<8x32xf32>,
    } else {
    }
    %c0 = arith.constant 0 : index
    %c0_1 = arith.constant 0 : index
    %3 = vector.load %arg12[%c0, %c0_1] : memref<8x32xf32, #tpu.memory_space<vmem>>, vector<8x32xf32>
    %4 = arith.truncf %3 : vector<8x32xf32> to vector<8x32xbf16>
    %c0_2 = arith.constant 0 : index
    %c0_3 = arith.constant 0 : index
    %c0_4 = arith.constant 0 : index
    %5 = vector.load %arg3[%c0_2, %c0_3, %c0_4] : memref<1x32x96xbf16, #tpu.memory_space<vmem>>, vector<1x32x96xbf16>
    %6 = vector.shape_cast %5 : vector<1x32x96xbf16> to vector<32x96xbf16>
    %cst = arith.constant dense<0.000000e+00> : vector<8x96xf32>
    %7 = tpu.matmul %4, %6, %cst {dimension_numbers = #tpu.dot_dimension_numbers<[1], [0], [0], [1], [0, 0, 1, 1], [], []>} : vector<8x32xbf16>, vector<32x96xbf16>, vector<8x96xf32> -> vector<8x96xf32>
    %c0_5 = arith.constant 0 : index
    %c0_6 = arith.constant 0 : index
    %c0_7 = arith.constant 0 : index
    %8 = vector.load %arg4[%c0_5, %c0_6, %c0_7] : memref<1x1x96xf32, #tpu.memory_space<vmem>>, vector<1x1x96xf32>
    %9 = vector.shape_cast %8 : vector<1x1x96xf32> to vector<1x96xf32>
    %10 = vector.broadcast %9 : vector<1x96xf32> to vector<8x96xf32>
    %11 = arith.addf %7, %10 : vector<8x96xf32>
    %12 = vector.extract_strided_slice %11 {offsets = [0, 0], sizes = [8, 32], strides = [1, 1]} : vector<8x96xf32> to vector<8x32xf32>
    %13 = vector.extract_strided_slice %11 {offsets = [0, 32], sizes = [8, 32], strides = [1, 1]} : vector<8x96xf32> to vector<8x32xf32>
    %14 = vector.extract_strided_slice %11 {offsets = [0, 64], sizes = [8, 32], strides = [1, 1]} : vector<8x96xf32> to vector<8x32xf32>
    %15 = vector.extract_strided_slice %12 {offsets = [0, 0], sizes = [8, 8], strides = [1, 1]} : vector<8x32xf32> to vector<8x8xf32>
    %16 = vector.extract_strided_slice %12 {offsets = [0, 8], sizes = [8, 8], strides = [1, 1]} : vector<8x32xf32> to vector<8x8xf32>
    %17 = vector.extract_strided_slice %12 {offsets = [0, 16], sizes = [8, 8], strides = [1, 1]} : vector<8x32xf32> to vector<8x8xf32>
    %18 = vector.extract_strided_slice %12 {offsets = [0, 24], sizes = [8, 8], strides = [1, 1]} : vector<8x32xf32> to vector<8x8xf32>
    %19 = vector.shape_cast %15 : vector<8x8xf32> to vector<1x8x8xf32>
    %20 = vector.shape_cast %16 : vector<8x8xf32> to vector<1x8x8xf32>
    %21 = vector.shape_cast %17 : vector<8x8xf32> to vector<1x8x8xf32>
    %22 = vector.shape_cast %18 : vector<8x8xf32> to vector<1x8x8xf32>
    %23 = tpu.concatenate %19, %20, %21, %22 in 0 : vector<1x8x8xf32>, vector<1x8x8xf32>, vector<1x8x8xf32>, vector<1x8x8xf32> -> vector<4x8x8xf32>
    %24 = arith.truncf %23 : vector<4x8x8xf32> to vector<4x8x8xbf16>
    %25 = vector.extract_strided_slice %13 {offsets = [0, 0], sizes = [8, 8], strides = [1, 1]} : vector<8x32xf32> to vector<8x8xf32>
    %26 = vector.extract_strided_slice %13 {offsets = [0, 8], sizes = [8, 8], strides = [1, 1]} : vector<8x32xf32> to vector<8x8xf32>
    %27 = vector.extract_strided_slice %13 {offsets = [0, 16], sizes = [8, 8], strides = [1, 1]} : vector<8x32xf32> to vector<8x8xf32>
    %28 = vector.extract_strided_slice %13 {offsets = [0, 24], sizes = [8, 8], strides = [1, 1]} : vector<8x32xf32> to vector<8x8xf32>
    %29 = vector.shape_cast %25 : vector<8x8xf32> to vector<1x8x8xf32>
    %30 = vector.shape_cast %26 : vector<8x8xf32> to vector<1x8x8xf32>
    %31 = vector.shape_cast %27 : vector<8x8xf32> to vector<1x8x8xf32>
    %32 = vector.shape_cast %28 : vector<8x8xf32> to vector<1x8x8xf32>
    %33 = tpu.concatenate %29, %30, %31, %32 in 0 : vector<1x8x8xf32>, vector<1x8x8xf32>, vector<1x8x8xf32>, vector<1x8x8xf32> -> vector<4x8x8xf32>
    %34 = arith.truncf %33 : vector<4x8x8xf32> to vector<4x8x8xbf16>
    %35 = vector.extract_strided_slice %14 {offsets = [0, 0], sizes = [8, 8], strides = [1, 1]} : vector<8x32xf32> to vector<8x8xf32>
    %36 = vector.extract_strided_slice %14 {offsets = [0, 8], sizes = [8, 8], strides = [1, 1]} : vector<8x32xf32> to vector<8x8xf32>
    %37 = vector.extract_strided_slice %14 {offsets = [0, 16], sizes = [8, 8], strides = [1, 1]} : vector<8x32xf32> to vector<8x8xf32>
    %38 = vector.extract_strided_slice %14 {offsets = [0, 24], sizes = [8, 8], strides = [1, 1]} : vector<8x32xf32> to vector<8x8xf32>
    %39 = vector.shape_cast %35 : vector<8x8xf32> to vector<1x8x8xf32>
    %40 = vector.shape_cast %36 : vector<8x8xf32> to vector<1x8x8xf32>
    %41 = vector.shape_cast %37 : vector<8x8xf32> to vector<1x8x8xf32>
    %42 = vector.shape_cast %38 : vector<8x8xf32> to vector<1x8x8xf32>
    %43 = tpu.concatenate %39, %40, %41, %42 in 0 : vector<1x8x8xf32>, vector<1x8x8xf32>, vector<1x8x8xf32>, vector<1x8x8xf32> -> vector<4x8x8xf32>
    %44 = arith.truncf %43 : vector<4x8x8xf32> to vector<4x8x8xbf16>
    "tpu.trace_start"() <{level = 10 : i32, message = "hqd,hkd->hqk"}> : () -> ()
    %cst_8 = arith.constant dense<0.000000e+00> : vector<4x8x8xf32>
    %45 = tpu.matmul %24, %34, %cst_8 {dimension_numbers = #tpu.dot_dimension_numbers<[2], [2], [1], [1], [0, 0, 0, 1, 1, 1], [0], [0]>} : vector<4x8x8xbf16>, vector<4x8x8xbf16>, vector<4x8x8xf32> -> vector<4x8x8xf32>
    "tpu.trace_stop"() : () -> ()
    %cst_9 = arith.constant dense<0xFF800000> : vector<4x8xf32>
    %46 = vector.multi_reduction <maximumf>, %45, %cst_9 [2] : vector<4x8x8xf32> to vector<4x8xf32>
    %47 = vector.shape_cast %46 : vector<4x8xf32> to vector<4x8x1xf32>
    %48 = vector.broadcast %47 : vector<4x8x1xf32> to vector<4x8x8xf32>
    %49 = arith.subf %45, %48 : vector<4x8x8xf32>
    %50 = math.exp %49 : vector<4x8x8xf32>
    %cst_10 = arith.constant dense<0.000000e+00> : vector<4x8xf32>
    %51 = vector.multi_reduction <add>, %50, %cst_10 [2] : vector<4x8x8xf32> to vector<4x8xf32>
    %52 = vector.shape_cast %51 : vector<4x8xf32> to vector<4x8x1xf32>
    %53 = tpu.reciprocal %52 {approx = true} : vector<4x8x1xf32> -> vector<4x8x1xf32>
    %54 = vector.broadcast %53 : vector<4x8x1xf32> to vector<4x8x8xf32>
    %55 = arith.mulf %50, %54 : vector<4x8x8xf32>
    %56 = arith.truncf %55 : vector<4x8x8xf32> to vector<4x8x8xbf16>
    "tpu.trace_start"() <{level = 10 : i32, message = "hqk,hkd->hqd"}> : () -> ()
    %cst_11 = arith.constant dense<0.000000e+00> : vector<4x8x8xf32>
    %57 = tpu.matmul %56, %44, %cst_11 {dimension_numbers = #tpu.dot_dimension_numbers<[2], [1], [1], [2], [0, 0, 0, 1, 1, 2], [0], [0]>} : vector<4x8x8xbf16>, vector<4x8x8xbf16>, vector<4x8x8xf32> -> vector<4x8x8xf32>
    "tpu.trace_stop"() : () -> ()
    %58 = vector.extract_strided_slice %57 {offsets = [0, 0, 0], sizes = [1, 8, 8], strides = [1, 1, 1]} : vector<4x8x8xf32> to vector<1x8x8xf32>
    %59 = vector.shape_cast %58 : vector<1x8x8xf32> to vector<8x8xf32>
    %60 = vector.extract_strided_slice %57 {offsets = [1, 0, 0], sizes = [1, 8, 8], strides = [1, 1, 1]} : vector<4x8x8xf32> to vector<1x8x8xf32>
    %61 = vector.shape_cast %60 : vector<1x8x8xf32> to vector<8x8xf32>
    %62 = vector.extract_strided_slice %57 {offsets = [2, 0, 0], sizes = [1, 8, 8], strides = [1, 1, 1]} : vector<4x8x8xf32> to vector<1x8x8xf32>
    %63 = vector.shape_cast %62 : vector<1x8x8xf32> to vector<8x8xf32>
    %64 = vector.extract_strided_slice %57 {offsets = [3, 0, 0], sizes = [1, 8, 8], strides = [1, 1, 1]} : vector<4x8x8xf32> to vector<1x8x8xf32>
    %65 = vector.shape_cast %64 : vector<1x8x8xf32> to vector<8x8xf32>
    %66 = tpu.concatenate %59, %61, %63, %65 in 1 : vector<8x8xf32>, vector<8x8xf32>, vector<8x8xf32>, vector<8x8xf32> -> vector<8x32xf32>
    %67 = arith.truncf %66 : vector<8x32xf32> to vector<8x32xbf16>
    %c0_12 = arith.constant 0 : index
    %c0_13 = arith.constant 0 : index
    %c0_14 = arith.constant 0 : index
    %68 = vector.load %arg5[%c0_12, %c0_13, %c0_14] : memref<1x32x32xbf16, #tpu.memory_space<vmem>>, vector<1x32x32xbf16>
    %69 = vector.shape_cast %68 : vector<1x32x32xbf16> to vector<32x32xbf16>
    %cst_15 = arith.constant dense<0.000000e+00> : vector<8x32xf32>
    %70 = tpu.matmul %67, %69, %cst_15 {dimension_numbers = #tpu.dot_dimension_numbers<[1], [0], [0], [1], [0, 0, 1, 1], [], []>} : vector<8x32xbf16>, vector<32x32xbf16>, vector<8x32xf32> -> vector<8x32xf32>
    %c0_16 = arith.constant 0 : index
    %c0_17 = arith.constant 0 : index
    %c0_18 = arith.constant 0 : index
    %71 = vector.load %arg6[%c0_16, %c0_17, %c0_18] : memref<1x1x32xf32, #tpu.memory_space<vmem>>, vector<1x1x32xf32>
    %72 = vector.shape_cast %71 : vector<1x1x32xf32> to vector<1x32xf32>
    %73 = vector.broadcast %72 : vector<1x32xf32> to vector<8x32xf32>
    %74 = arith.addf %70, %73 : vector<8x32xf32>
    %75 = arith.truncf %74 : vector<8x32xf32> to vector<8x32xbf16>
    %c0_19 = arith.constant 0 : index
    %c0_20 = arith.constant 0 : index
    %c0_21 = arith.constant 0 : index
    %76 = vector.load %arg7[%c0_19, %c0_20, %c0_21] : memref<1x32x64xbf16, #tpu.memory_space<vmem>>, vector<1x32x64xbf16>
    %77 = vector.shape_cast %76 : vector<1x32x64xbf16> to vector<32x64xbf16>
    %cst_22 = arith.constant dense<0.000000e+00> : vector<8x64xf32>
    %78 = tpu.matmul %75, %77, %cst_22 {dimension_numbers = #tpu.dot_dimension_numbers<[1], [0], [0], [1], [0, 0, 1, 1], [], []>} : vector<8x32xbf16>, vector<32x64xbf16>, vector<8x64xf32> -> vector<8x64xf32>
    %c0_23 = arith.constant 0 : index
    %c0_24 = arith.constant 0 : index
    %c0_25 = arith.constant 0 : index
    %79 = vector.load %arg8[%c0_23, %c0_24, %c0_25] : memref<1x1x64xf32, #tpu.memory_space<vmem>>, vector<1x1x64xf32>
    %80 = vector.shape_cast %79 : vector<1x1x64xf32> to vector<1x64xf32>
    %81 = vector.broadcast %80 : vector<1x64xf32> to vector<8x64xf32>
    %82 = arith.addf %78, %81 : vector<8x64xf32>
    %cst_26 = arith.constant 0.000000e+00 : f32
    %83 = vector.broadcast %cst_26 : f32 to vector<8x64xf32>
    %84 = arith.maximumf %82, %83 : vector<8x64xf32>
    %85 = arith.truncf %84 : vector<8x64xf32> to vector<8x64xbf16>
    %c0_27 = arith.constant 0 : index
    %c0_28 = arith.constant 0 : index
    %c0_29 = arith.constant 0 : index
    %86 = vector.load %arg9[%c0_27, %c0_28, %c0_29] : memref<1x64x32xbf16, #tpu.memory_space<vmem>>, vector<1x64x32xbf16>
    %87 = vector.shape_cast %86 : vector<1x64x32xbf16> to vector<64x32xbf16>
    %cst_30 = arith.constant dense<0.000000e+00> : vector<8x32xf32>
    %88 = tpu.matmul %85, %87, %cst_30 {dimension_numbers = #tpu.dot_dimension_numbers<[1], [0], [0], [1], [0, 0, 1, 1], [], []>} : vector<8x64xbf16>, vector<64x32xbf16>, vector<8x32xf32> -> vector<8x32xf32>
    %c0_31 = arith.constant 0 : index
    %c0_32 = arith.constant 0 : index
    %c0_33 = arith.constant 0 : index
    %89 = vector.load %arg10[%c0_31, %c0_32, %c0_33] : memref<1x1x32xf32, #tpu.memory_space<vmem>>, vector<1x1x32xf32>
    %90 = vector.shape_cast %89 : vector<1x1x32xf32> to vector<1x32xf32>
    %91 = vector.broadcast %90 : vector<1x32xf32> to vector<8x32xf32>
    %92 = arith.addf %88, %91 : vector<8x32xf32>
    %c0_34 = arith.constant 0 : index
    %c0_35 = arith.constant 0 : index
    %93 = vector.load %arg12[%c0_34, %c0_35] : memref<8x32xf32, #tpu.memory_space<vmem>>, vector<8x32xf32>
    tpu.vector_store %arg12[%c0_34, %c0_35], %92 {strides = array<i32>} : memref<8x32xf32, #tpu.memory_space<vmem>>, vector<8x32xf32>,
    %c1_i32 = arith.constant 1 : i32
    %94 = arith.cmpi eq, %arg1, %c1_i32 : i32
    %95 = arith.extui %94 : i1 to i32
    %c0_i32_36 = arith.constant 0 : i32
    %96 = arith.cmpi ne, %95, %c0_i32_36 : i32
    scf.if %96 {
      %c0_37 = arith.constant 0 : index
      %c0_38 = arith.constant 0 : index
      %c0_39 = arith.constant 0 : index
      %97 = vector.load %arg11[%c0_37, %c0_38, %c0_39] : memref<1x8x32xf32, #tpu.memory_space<vmem>>, vector<1x8x32xf32>
      %98 = vector.shape_cast %97 : vector<1x8x32xf32> to vector<8x32xf32>
      %99 = vector.shape_cast %92 : vector<8x32xf32> to vector<1x8x32xf32>
      tpu.vector_store %arg11[%c0_37, %c0_38, %c0_39], %99 {strides = array<i32>} : memref<1x8x32xf32, #tpu.memory_space<vmem>>, vector<1x8x32xf32>,
    } else {
    }
    return
  }
  func.func @transform_0(%arg0: i32, %arg1: i32) -> (i32, i32, i32) {
    %c0_i32 = arith.constant 0 : i32
    %c0_i32_0 = arith.constant 0 : i32
    %c0_i32_1 = arith.constant 0 : i32
    return %arg0, %c0_i32, %c0_i32_0 : i32, i32, i32
  }
  func.func @transform_1(%arg0: i32, %arg1: i32) -> (i32, i32, i32) {
    %c0_i32 = arith.constant 0 : i32
    %c0_i32_0 = arith.constant 0 : i32
    %c0_i32_1 = arith.constant 0 : i32
    return %arg1, %c0_i32, %c0_i32_0 : i32, i32, i32
  }
  func.func @transform_2(%arg0: i32, %arg1: i32) -> (i32, i32, i32) {
    %c0_i32 = arith.constant 0 : i32
    %c0_i32_0 = arith.constant 0 : i32
    %c0_i32_1 = arith.constant 0 : i32
    return %arg1, %c0_i32, %c0_i32_0 : i32, i32, i32
  }
  func.func @transform_3(%arg0: i32, %arg1: i32) -> (i32, i32, i32) {
    %c0_i32 = arith.constant 0 : i32
    %c0_i32_0 = arith.constant 0 : i32
    %c0_i32_1 = arith.constant 0 : i32
    return %arg1, %c0_i32, %c0_i32_0 : i32, i32, i32
  }
  func.func @transform_4(%arg0: i32, %arg1: i32) -> (i32, i32, i32) {
    %c0_i32 = arith.constant 0 : i32
    %c0_i32_0 = arith.constant 0 : i32
    %c0_i32_1 = arith.constant 0 : i32
    return %arg1, %c0_i32, %c0_i32_0 : i32, i32, i32
  }
  func.func @transform_5(%arg0: i32, %arg1: i32) -> (i32, i32, i32) {
    %c0_i32 = arith.constant 0 : i32
    %c0_i32_0 = arith.constant 0 : i32
    %c0_i32_1 = arith.constant 0 : i32
    return %arg1, %c0_i32, %c0_i32_0 : i32, i32, i32
  }
  func.func @transform_6(%arg0: i32, %arg1: i32) -> (i32, i32, i32) {
    %c0_i32 = arith.constant 0 : i32
    %c0_i32_0 = arith.constant 0 : i32
    %c0_i32_1 = arith.constant 0 : i32
    return %arg1, %c0_i32, %c0_i32_0 : i32, i32, i32
  }
  func.func @transform_7(%arg0: i32, %arg1: i32) -> (i32, i32, i32) {
    %c0_i32 = arith.constant 0 : i32
    %c0_i32_0 = arith.constant 0 : i32
    %c0_i32_1 = arith.constant 0 : i32
    return %arg1, %c0_i32, %c0_i32_0 : i32, i32, i32
  }
  func.func @transform_8(%arg0: i32, %arg1: i32) -> (i32, i32, i32) {
    %c0_i32 = arith.constant 0 : i32
    %c0_i32_0 = arith.constant 0 : i32
    %c0_i32_1 = arith.constant 0 : i32
    return %arg1, %c0_i32, %c0_i32_0 : i32, i32, i32
  }
  func.func @transform_9(%arg0: i32, %arg1: i32) -> (i32, i32, i32) {
    %c0_i32 = arith.constant 0 : i32
    %c0_i32_0 = arith.constant 0 : i32
    %c0_i32_1 = arith.constant 0 : i32
    return %arg0, %c0_i32, %c0_i32_0 : i32, i32, i32
  }
}

</mosaic_0001>

<bundles_post_ra>
// kernel: tpu_custom_call.1
= control target key start
LH: loop header
LB: loop body
LE: loop exit
PB: predicated region body
PF: predicated region fallthrough
CT: control target
= control target key end

     0   :  { %s2232_s0 = inlined_call_operand.hbm [shape: f32[2,8,32], index: 0, kind: input, shape index: {}]   ;;  %s2233_s1 = inlined_call_operand.vmem [shape: bf16[2,32,96], index: 1, kind: input, shape index: {}]   ;;  %s2234_s2 = inlined_call_operand.vmem [shape: f32[2,1,96], index: 2, kind: input, shape index: {}]   ;;  %s2235_s3 = inlined_call_operand.vmem [shape: bf16[2,32,32], index: 3, kind: input, shape index: {}]   ;;  %s2236_s4 = inlined_call_operand.vmem [shape: f32[2,1,32], index: 4, kind: input, shape index: {}]   ;;  %s2237_s5 = inlined_call_operand.vmem [shape: bf16[2,32,64], index: 5, kind: input, shape index: {}]   ;;  %s2238_s6 = inlined_call_operand.vmem [shape: f32[2,1,64], index: 6, kind: input, shape index: {}]   ;;  %s2239_s7 = inlined_call_operand.vmem [shape: bf16[2,64,32], index: 7, kind: input, shape index: {}]   ;;  %s2240_s8 = inlined_call_operand.vmem [shape: f32[2,1,32], index: 8, kind: input, shape index: {}]   ;;  %s2241_s9 = inlined_call_operand.hbm [shape: f32[2,8,32], index: 9, kind: output, shape index: {}]  }
   0x1   :  { %2252 = sst [smem:[#allocation19_spill]] %s2232_s0 }
   0x2   :  { %2253 = sst [smem:[#allocation20_spill]] %s2233_s1 }
   0x3   :  { %2254 = sst [smem:[#allocation21_spill]] %s2235_s3 }
   0x4   :  { %2255 = sst [smem:[#allocation22_spill]] %s2241_s9 }
   0x5   :  { %14 = vsyncpa [#allocation4], 0 }
   0x6   :  { %16 = vsyncpa [#allocation4 + $0x1], 0 }
   0x7   :  { %17 = vsyncpa [#allocation5], 0 }
   0x8   :  { %19 = vsyncpa [#allocation5 + $0x1], 0  ;;  %s1915_s30 = smov 0   ;;  %s1917_s10 = smov 0  }
   0x9   :  { %s1919_s11 = smov 0   ;;  %s1921_s12 = smov 0  }
   0xa   :  { %s1923_s13 = smov 0   ;;  %s1925_s14 = smov 0  }
   0xb   :  { %s1927_s15 = smov 0   ;;  %s1929_s16 = smov 0  }
   0xc LB: > { %2256 = sst [smem:[#allocation9_spill]] %s1823_s30  ;;  %s1446_s17 = sadd.s32 4294967295, %s1851_s16   ;;  %s1851_s16 = sphi %s1929_s16, %s25_s16   ;;  %s1847_s15 = sphi %s1927_s15, %s2287_s15   ;;  %s1843_s14 = sphi %s1925_s14, %s2286_s14   ;;  %s1839_s13 = sphi %s1923_s13, %s2285_s13   ;;  %s1835_s12 = sphi %s1921_s12, %s2284_s12   ;;  %s1831_s11 = sphi %s1919_s11, %s2283_s11   ;;  %s1827_s10 = sphi %s1917_s10, %s2282_s10   ;;  %s1823_s30 = sphi %s1915_s30, %s2281_s30  }
   0xd   : > { %2257 = sst [smem:[#allocation10_spill]] %s1827_s10  ;;  %s1447_s18 = sadd.s32 4294967294, %s1851_s16  }
   0xe   : > { %2258 = sst [smem:[#allocation11_spill]] %s1831_s11  ;;  %s34_s19 = sadd.s32 1, %s1843_s14 }
   0xf   : > { %2259 = sst [smem:[#allocation12_spill]] %s1843_s14  ;;  %s37_s20 = sadd.s32 1, %s1847_s15 }
  0x10   : > { %2260 = sst [smem:[#allocation13_spill]] %s1847_s15  ;;  %p35_p0 = scmp.ge.s32.totalorder %s34_s19, 2 }
  0x11   : > { %2261 = sst [smem:[#allocation14_spill]] %s1851_s16  ;;  %s44_s21 = sadd.s32 1, %s1831_s11 }
  0x12   : > { %p51_p1 = scmp.ne.s32.totalorder %s1831_s11, %s1827_s10  ;;  %p52_p2 = scmp.eq.s32.totalorder %s1851_s16, 0 }
  0x13   : > { %s2289_s19 = smov (%p35_p0, %s34_s19), 0  ;;  %s2291_s20 = smov (!%p35_p0, %s37_s20), %s1847_s15 }
  0x14   : > { %2262 = sst [smem:[#allocation15_spill]] %s2289_s19  ;;  %p1966_p3 = por %p52_p2, %p51_p1 }
  0x15   : > { %p57_p4 = scmp.ne.s32.totalorder %s1827_s10, %s1823_s30  ;;  %p39_p5 = scmp.ge.s32.totalorder %s2291_s20, 2 }
  0x16   : > { %p58_p6 = scmp.eq.s32.totalorder %s1446_s17, 0  ;;  %p289_p7 = scmp.eq.s32.totalorder %s1446_s17, 3 }
  0x17   : > { %p295_p8 = scmp.eq.s32.totalorder %s1447_s18, 3  ;;  %s2293_s20 = smov (%p39_p5, %s2291_s20), 0 }
  0x18   : > { %2264 = sst [smem:[#allocation16_spill]] %s2293_s20  ;;  %p1974_p9 = por %p58_p6, %p57_p4 }
  0x19   : > { %p1978_p10 = por %p289_p7, %p51_p1  ;;  %s41_s25 = ssub.s32 %s1847_s15, %s2293_s20 }
  0x1a   : > { %p1984_p11 = por %p295_p8, %p57_p4  ;;  %p42_p12 = scmp.eq.s32.totalorder %s41_s25, 0 }
  0x1b   : > { %p1625_p13 = scmp.lt.s32.totalorder %s1851_s16, 4  ;;  %s315_s27 = sand.u32 1, %s1831_s11  }
  0x1c   : > { %s2267_s26 = scalar_select %p1984_p11, 1, 0 }
  0x1d   : > { %s1991_s28 = scalar_select %p42_p12, %s1831_s11, %s44_s21  }
  0x1e   : > { %2268 = sst [smem:[#allocation17_spill]] %s2267_s26  ;;  %s1450_s29 = sshll.u32 %s315_s27, 3 }
  0x1f   : > { %2269 = sst [smem:[#allocation18_spill]] %s1991_s28  ;;  %s1451_s17 = sshll.u32 %s1847_s15, 7 }
  0x20   : > { %s2270_s0 = sld [smem:[#allocation19_spill]]  ;;  %s319_s30 = scalar_lea.vmem [#allocation3], %s1450_s29 }
  0x21   : > { %s326_s9 = sshll.u32 %s319_s30, 4  ;;  %p1999_p0 = pnand %p1625_p13, %p1966_p3  ;;  %s327_s9 = int_to_ptr.vmem [resolvable:$true] %s326_s9 }
  0x22   : > { %p1452_p1 = scmp.ge.s32.totalorder %s1851_s16, 1  ;;  %p387_p2 = scmp.lt.s32.totalorder %s1851_s16, 5 }
  0x23   : > { %s316_s25 = scalar_lea.sflag [#allocation4], %s315_s27  ;;  %p1729_p4 = pneg %p1999_p0 }
  0x24   : > { %s1740_s21 = scalar_lea.vmem %s327_s9, 128  ;;  %s1853_s19 = smov [#allocation3]  }
  0x25   : > { %p1741_p5 = scmp.ne.s32.totalorder %s327_s9, %s1740_s21 }
  0x26   : > { %s324_s14 = scalar_lea.hbm %s2270_s0, %s1451_s17  ;;  %s1745_s17 = sshll.u32 %s1853_s19, 4  ;;  %s1746_s17 = int_to_ptr.vmem [resolvable:$false] %s1745_s17 }
  0x27   : > { %p1743_p6 = pnand %p1741_p5, %p1729_p4  ;;  %s1747_s30 = scalar_lea.vmem %s1746_s17, 256 }
  0x28   : > { %p1748_p8 = scmp.lt.s32.totalorder %s327_s9, %s1746_s17  ;;  %p1749_p12 = scmp.lt.s32.totalorder %s1747_s30, %s1740_s21 }
  0x29   : > { %p1744_p7 = pneg %p1743_p6 }
  0x2a   : > { %p1750_p3 = por %p1749_p12, %p1748_p8 }
  0x2c   : > { %p1751_p13 = pnand %p1750_p3, %p1744_p7 }
  0x2e   : > { %1754 = shalt.err (!%p1751_p13)
}
  0x2f   : > { %1620 = dma.hbm_to_vmem [thread:$0]  (!%p1999_p0), %s324_s14, 128, %s327_s9, %s316_s25  }
  0x30   : > { %p388_p11 = pnand %p1452_p1, %p387_p2 }
  0x31   : > { %s2014_s22 = sand.u32 (!%p388_p11), 1, %s1827_s10  }
  0x32   : > { %391 = sbr.rel (%p388_p11) target bundleno = 1960 (0x7a8), region = 56  ;;  %s1453_s27 = sshll.u32 (!%p388_p11), %s2014_s22, 3 }
  0x33   : > { %s394_s29 = scalar_lea.sflag (!%p388_p11), [#allocation4], %s2014_s22  ;;  %s397_s18 = scalar_lea.vmem (!%p388_p11), [#allocation3], %s1453_s27 }
  0x37   : > { %1814 = dma.done.wait (%p1974_p9), %s394_s29, 128  }
  0x38   : > { %1816 = vsyncadd (%p1974_p9), %s394_s29, 4294967168  ;;  %p464_p0 = scmp.lt.s32.totalorder %s1835_s12, 1  ;;  %s2272_s1 = sld [smem:[#allocation20_spill]] }
  0x39   : > { %s2273_s3 = sld [smem:[#allocation21_spill]]  ;;  %s2062_s28 = scalar_lea.vmem [#allocation6], %s1453_s27 }
  0x3a   : > { %s2024_s9 = scalar_select %p464_p0, %s1835_s12, 1 }
  0x3b   : > { %p1463_p9 = scmp.ne.s32.totalorder %s1835_s12, 0 }
  0x3c   : > { %s1495_s14 = sshll.u32 %s2024_s9, 4  ;;  %s479_s11 = scalar_lea.vmem %s2236_s4, %s2024_s9 }
  0x3d   : > { %s2046_s16 = scalar_lea.vmem %s2237_s5, %s1495_s14  ;;  %s487_s21 = scalar_lea.vmem %s2238_s6, %s2024_s9 }
  0x3e   : > { %s468_s23 = scalar_lea.vmem %s2272_s1, %s1495_s14  ;;  %s1498_s19 = sshll.u32 %s2024_s9, 5 }
  0x3f   : > { %s2037_s0 = scalar_lea.vmem %s2273_s3, %s1495_s14  ;;  %s2056_s30 = scalar_lea.vmem %s2239_s7, %s1498_s19 }
  0x40   : > { %s495_s15 = scalar_lea.vmem %s2240_s8, %s2024_s9  ;;  %500 = sbr.rel (%p1463_p9) target bundleno = 71 (0x47), region = 64 }
  0x45   : > { %v501_v0 = vld [vmem:[%s397_s18] sm:$0xff]  ;;  %vm502_vm0 = vcmask 261120  }
  0x46   : > { %503 = vst.msk [vmem:[#allocation2] sm:$0xff] %vm502_vm0, %v501_v0 }
  0x47 PF: > { %v1701_v1 = vld [vmem:[%s468_s23 + $0x8] sm:$0xff]   ;;  %v1854_v2 = vmov 0.0   ;;  %v1702_v3 = vld [vmem:[%s468_s23] sm:$0xff]   ;;  %vm1855_vm1 = vmmov 0   ;;  %vm529_vm2 = vcmask 261120   ;;  %s2274_s10 = scalar_lea.vmem %s2234_s2, %s2024_s9  ;;  %s1856_s26 = smov 104  }
  0x48   : > { %1529 = vmatprep.subr.bf16.mxu0 %v1854_v2  ;;  %1537 = vmatprep.subr.bf16.mxu1 %v1854_v2  ;;  %v1464_v6 = vld [vmem:[%s2274_s10] ss:$0 sm:$0xff]  ;;  %s1857_s27 = smov 120   ;;  %s1858_s18 = smov 112   ;;  %vm590_vm3 = vcmask 64512   ;;  %vm837_vm4 = vcmask 1043456  }
  0x49   : > { %1530 = vmatpush3.bf16.msra.mxu0 %v1701_v1  ;;  %1533 = vmatprep.mubr.msk.bf16.mxu0 %vm1855_vm1, %v1854_v2  ;;  %s1859_s14 = smov 96   ;;  %s1860_s23 = smov 64   ;;  %vm1038_vm5 = vcmask 130048   ;;  %vm1040_vm6 = vcmask 195584   ;;  %vm1217_vm7 = vcmask 523264  }
  0x4a   : > { %1531 = vmatprep.subr.bf16.mxu0 %v1854_v2  ;;  %1539 = vmatprep.mubr.msk.bf16.mxu1 %vm1855_vm1, %v1854_v2  ;;  %s1861_s20 = smov 8   ;;  %s1862_s25 = smov 16  }
  0x4b   : > { %p1490_p11 = scmp.ne.s32.totalorder %s1835_s12, 1 }
  0x4d   : > { %v504_v4 = vld [vmem:[#allocation2] sm:$0xff]  ;;  %1532 = vmatpush3.bf16.msra.mxu0 %v1702_v3 }
  0x4e   : > { %v505_v5 = vpack.c.bf16 %v504_v4, %v504_v4  ;;  %1543 = vmatprep.subr.bf16.mxu0 %v1854_v2 }
  0x50   : > { %1534 = vmatmul.mubr.msk.bf16.vlgmr.msra.gmra.mxu0 %vm529_vm2, %v505_v5 }
  0x51   : > { %1545 = vmatprep.mubr.msk.bf16.mxu0 %vm1855_vm1, %v1854_v2 }
 0x110   : > { %v567_v7 = vpop.f32.mrf.mxu0 }
 0x111   : > { %v568_v8 = vadd.f32 %v1464_v6, %v567_v7 }
 0x112   : > { %v1535_v9 = vpop.f32.mrf.mxu0 }
 0x113   : > { %580 = vrot.lane.b32.xlu1 %v568_v8, %s1856_s26  ;;  %574 = vrot.lane.b32.xlu0 %v568_v8, %s1857_s27  ;;  %v2081_v11 = vpack.c.bf16 %v568_v8, %v568_v8 }
 0x114   : > { %v570_v10 = vpop.f32.mrf.mxu0 }
 0x116   : > { %v1536_v12 = vpop.f32.mrf.mxu0 }
 0x117   : > { %577 = vrot.lane.b32.xlu0 %v568_v8, %s1858_s18  ;;  %588 = vrot.lane.b32.xlu1 %v2081_v11, %s1859_s14 }
 0x185   : > { %v581_v13 = vpop.permute.xlu1 %580  ;;  %v575_v14 = vpop.permute.xlu0 %574 }
 0x186   : > { %v584_v15 = vpack.c.bf16 %v575_v14, %v575_v14  ;;  %v2084_v18 = vpack.c.bf16 %v581_v13, %v581_v13 }
 0x188   : > { %638 = vrot.lane.b32.xlu0 %v584_v15, %s1859_s14 }
 0x189   : > { %v578_v16 = vpop.permute.xlu0 %577  ;;  %v589_v17 = vpop.permute.xlu1 %588 }
 0x18a   : > { %v2086_v19 = vpack.c.bf16 %v578_v16, %v578_v16  ;;  %v595_v20 = vsel %vm590_vm3, %v589_v17, 0 }
 0x18b   : > { %1538 = vmatpush3.bf16.xpose.msra.mxu1 %v595_v20 }
 0x18c   : > { %736 = vrot.lane.b32.xlu0 %v2084_v18, %s1859_s14  ;;  %687 = vrot.lane.b32.xlu1 %v2086_v19, %s1859_s14 }
 0x18d   : > { %1549 = vmatprep.subr.bf16.mxu1 %v1854_v2 }
 0x192   : > { %1540 = vmatmul.mubr.msk.bf16.vlgmr.msra.gmra.mxu1 %vm590_vm3, %v2081_v11 }
 0x193   : > { %1551 = vmatprep.mubr.msk.bf16.mxu1 %vm1855_vm1, %v1854_v2 }
 0x1fa   : > { %v639_v21 = vpop.permute.xlu0 %638 }
 0x1fb   : > { %v644_v22 = vsel %vm590_vm3, %v639_v21, 0 }
 0x1fc   : > { %1544 = vmatpush3.bf16.xpose.msra.mxu0 %v644_v22 }
 0x1fd   : > { %1555 = vmatprep.subr.bf16.mxu0 %v1854_v2 }
 0x1fe   : > { %v688_v23 = vpop.permute.xlu1 %687  ;;  %v737_v25 = vpop.permute.xlu0 %736 }
 0x1ff   : > { %v693_v24 = vsel %vm590_vm3, %v688_v23, 0  ;;  %v742_v26 = vsel %vm590_vm3, %v737_v25, 0 }
 0x200   : > { %1550 = vmatpush3.bf16.xpose.msra.mxu1 %v693_v24 }
 0x201   : > { %1561 = vmatprep.subr.bf16.mxu1 %v1854_v2 }
 0x203   : > { %1546 = vmatmul.mubr.msk.bf16.vlgmr.msra.gmra.mxu0 %vm590_vm3, %v584_v15 }
 0x204   : > { %1556 = vmatpush3.bf16.xpose.msra.mxu0 %v742_v26  ;;  %1557 = vmatprep.mubr.msk.bf16.mxu0 %vm1855_vm1, %v1854_v2 }
 0x205   : > { %1567 = vmatprep.subr.bf16.mxu0 %v1854_v2 }
 0x207   : > { %1552 = vmatmul.mubr.msk.bf16.vlgmr.msra.gmra.mxu1 %vm590_vm3, %v2086_v19 }
 0x208   : > { %1563 = vmatprep.mubr.msk.bf16.mxu1 %vm1855_vm1, %v1854_v2 }
 0x20b   : > { %1558 = vmatmul.mubr.msk.bf16.vlgmr.msra.gmra.mxu0 %vm590_vm3, %v2084_v18 }
 0x20c   : > { %1569 = vmatprep.mubr.msk.bf16.mxu0 %vm1855_vm1, %v1854_v2 }
 0x252   : > { %v631_v27 = vpop.f32.mrf.mxu1 }
 0x253   : > { %v784_v28 = vsel %vm590_vm3, %v631_v27, -inf }
 0x254   : > { %785 = vmax.xlane.f32.xlu1 %v784_v28  ;;  %v1541_v29 = vpop.f32.mrf.mxu1 }
 0x256   : > { %v634_v30 = vpop.f32.mrf.mxu1 }
 0x258   : > { %v1542_v31 = vpop.f32.mrf.mxu1 }
 0x2c3   : > { %v680_v32 = vpop.f32.mrf.mxu0 }
 0x2c4   : > { %v787_v33 = vsel %vm590_vm3, %v680_v32, -inf }
 0x2c5   : > { %788 = vmax.xlane.f32.xlu0 %v787_v33  ;;  %v1547_v34 = vpop.f32.mrf.mxu0  ;;  %v1704_v33 = vld [vmem:[%s2037_s0] sm:$0xff]  }
 0x2c6   : > { %v1705_v34 = vld [vmem:[%s2046_s16 + $0x8] sm:$0xff]  }
 0x2c7   : > { %v683_v35 = vpop.f32.mrf.mxu0  ;;  %v729_v36 = vpop.f32.mrf.mxu1 }
 0x2c8   : > { %v790_v37 = vsel %vm590_vm3, %v729_v36, -inf }
 0x2c9   : > { %v1553_v38 = vpop.f32.mrf.mxu1  ;;  %791 = vmax.xlane.f32.xlu0 %v790_v37  ;;  %v1548_v39 = vpop.f32.mrf.mxu0 }
 0x2cb   : > { %v732_v40 = vpop.f32.mrf.mxu1  ;;  %v778_v41 = vpop.f32.mrf.mxu0 }
 0x2cc   : > { %v793_v42 = vsel %vm590_vm3, %v778_v41, -inf }
 0x2cd   : > { %v1554_v43 = vpop.f32.mrf.mxu1  ;;  %794 = vmax.xlane.f32.xlu1 %v793_v42  ;;  %v1559_v44 = vpop.f32.mrf.mxu0 }
 0x2cf   : > { %v781_v45 = vpop.f32.mrf.mxu0 }
 0x2d1   : > { %v1560_v46 = vpop.f32.mrf.mxu0 }
 0x2dd   : > { %v786_v47 = vpop.xlane.xlu1 %785 }
 0x2de   : > { %881 = vrot.lane.b32.xlu1 %v584_v15, %s1860_s23  ;;  %v796_v48 = vsub.f32 %v631_v27, %v786_v47 }
 0x2df   : > { %832 = vrot.lane.b32.xlu0 %v2081_v11, %s1860_s23 }
 0x2e0   : > { %v800_v49 = vmul.f32 1.442695, %v796_v48 }
 0x2e2   : > { %1711 = vpow2.f32 %v800_v49 }
 0x2ef   : > { %v1712_v50 = vpop.eup %1711 }
 0x2f0   : > { %v808_v51 = vsel %vm590_vm3, %v1712_v50, 0.0 }
 0x2fe   : > { %809 = vadd.xlane.f32.xlu0 %v808_v51 }
 0x34e   : > { %v789_v52 = vpop.xlane.xlu0 %788 }
 0x34f   : > { %v797_v53 = vsub.f32 %v680_v32, %v789_v52  ;;  %v1703_v32 = vld [vmem:[%s2037_s0 + $0x8] sm:$0xff]   ;;  %s1863_s0 = smov 24  }
 0x351   : > { %v802_v54 = vmul.f32 1.442695, %v797_v53 }
 0x352   : > { %v792_v55 = vpop.xlane.xlu0 %791 }
 0x353   : > { %1713 = vpow2.f32 %v802_v54  ;;  %v798_v56 = vsub.f32 %v729_v36, %v792_v55  ;;  %v1706_v54 = vld [vmem:[%s2046_s16] sm:$0xff]   ;;  %v1707_v55 = vld [vmem:[%s2056_s30 + $0x18] sm:$0xff]  }
 0x355   : > { %v804_v57 = vmul.f32 1.442695, %v798_v56  ;;  %v1708_v56 = vld [vmem:[%s2056_s30 + $0x10] sm:$0xff]  }
 0x356   : > { %v833_v58 = vpop.permute.xlu0 %832  ;;  %v795_v59 = vpop.xlane.xlu1 %794 }
 0x357   : > { %1715 = vpow2.f32 %v804_v57  ;;  %v839_v60 = vsel %vm837_vm4, %v833_v58, 0  ;;  %v799_v61 = vsub.f32 %v778_v41, %v795_v59  ;;  %v1476_v57 = vld [vmem:[%s479_s11] ss:$0 sm:$0xff] }
 0x358   : > { %1562 = vmatpush3.bf16.msra.mxu1 %v839_v60 }
 0x359   : > { %v806_v62 = vmul.f32 1.442695, %v799_v61  ;;  %1573 = vmatprep.subr.bf16.mxu1 %v1854_v2 }
 0x35a   : > { %v882_v63 = vpop.permute.xlu1 %881 }
 0x35b   : > { %1717 = vpow2.f32 %v806_v62  ;;  %v887_v0 = vsel %vm837_vm4, %v882_v63, 0 }
 0x35c   : > { %1568 = vmatpush3.bf16.msra.mxu0 %v887_v0  ;;  %v1709_v0 = vld [vmem:[%s2056_s30 + $0x8] sm:$0xff]  }
 0x35d   : > { %1579 = vmatprep.subr.bf16.mxu0 %v1854_v2 }
 0x360   : > { %v1714_v1 = vpop.eup %1713 }
 0x361   : > { %v811_v3 = vsel %vm590_vm3, %v1714_v1, 0.0 }
 0x362   : > { %812 = vadd.xlane.f32.xlu1 %v811_v3  ;;  %v1480_v3 = vld [vmem:[%s487_s21] ss:$0 sm:$0xff] }
 0x364   : > { %v1716_v4 = vpop.eup %1715 }
 0x365   : > { %v814_v5 = vsel %vm590_vm3, %v1716_v4, 0.0 }
 0x366   : > { %815 = vadd.xlane.f32.xlu0 %v814_v5 }
 0x368   : > { %v1718_v6 = vpop.eup %1717 }
 0x369   : > { %v817_v7 = vsel %vm590_vm3, %v1718_v6, 0.0 }
 0x36a   : > { %818 = vadd.xlane.f32.xlu1 %v817_v7 }
 0x37b   : > { %929 = vrot.lane.b32.xlu1 %v2086_v19, %s1860_s23 }
 0x37c   : > { %977 = vrot.lane.b32.xlu0 %v2084_v18, %s1860_s23 }
 0x387   : > { %v810_v8 = vpop.xlane.xlu0 %809 }
 0x388   : > { %1719 = vrcp.f32 %v810_v8 }
 0x395   : > { %v1720_v9 = vpop.eup %1719 }
 0x396   : > { %v824_v10 = vmul.f32 %v1720_v9, %v1712_v50 }
 0x398   : > { %v828_v11 = vpack.c.bf16 %v824_v10, %v824_v10 }
 0x39a   : > { %1564 = vmatmul.mubr.msk.bf16.vlgmr.msra.gmra.mxu1 %vm590_vm3, %v828_v11 }
 0x39b   : > { %1575 = vmatprep.mubr.msk.bf16.mxu1 %vm1855_vm1, %v1854_v2 }
 0x3eb   : > { %v813_v12 = vpop.xlane.xlu1 %812 }
 0x3ec   : > { %1721 = vrcp.f32 %v813_v12 }
 0x3ef   : > { %v816_v13 = vpop.xlane.xlu0 %815 }
 0x3f0   : > { %1723 = vrcp.f32 %v816_v13 }
 0x3f3   : > { %v819_v14 = vpop.xlane.xlu1 %818  ;;  %v978_v19 = vpop.permute.xlu0 %977 }
 0x3f4   : > { %1725 = vrcp.f32 %v819_v14  ;;  %v983_v22 = vsel %vm837_vm4, %v978_v19, 0 }
 0x3f7   : > { %v930_v15 = vpop.permute.xlu1 %929 }
 0x3f8   : > { %v935_v16 = vsel %vm837_vm4, %v930_v15, 0 }
 0x3f9   : > { %v1722_v17 = vpop.eup %1721  ;;  %1574 = vmatpush3.bf16.msra.mxu1 %v935_v16 }
 0x3fa   : > { %v825_v18 = vmul.f32 %v1722_v17, %v1714_v1  ;;  %1585 = vmatprep.subr.bf16.mxu1 %v1854_v2  ;;  %v1710_v1 = vld [vmem:[%s2056_s30] sm:$0xff]  }
 0x3fc   : > { %v829_v20 = vpack.c.bf16 %v825_v18, %v825_v18 }
 0x3fd   : > { %v1724_v21 = vpop.eup %1723 }
 0x3fe   : > { %1570 = vmatmul.mubr.msk.bf16.vlgmr.msra.gmra.mxu0 %vm590_vm3, %v829_v20  ;;  %v826_v23 = vmul.f32 %v1724_v21, %v1716_v4 }
 0x3ff   : > { %1580 = vmatpush3.bf16.msra.mxu0 %v983_v22  ;;  %1581 = vmatprep.mubr.msk.bf16.mxu0 %vm1855_vm1, %v1854_v2 }
 0x400   : > { %v830_v24 = vpack.c.bf16 %v826_v23, %v826_v23  ;;  %1593 = vmatprep.subr.bf16.mxu0 %v1854_v2 }
 0x401   : > { %v1726_v25 = vpop.eup %1725 }
 0x402   : > { %1576 = vmatmul.mubr.msk.bf16.vlgmr.msra.gmra.mxu1 %vm590_vm3, %v830_v24  ;;  %v827_v26 = vmul.f32 %v1726_v25, %v1718_v6 }
 0x403   : > { %1589 = vmatprep.mubr.msk.bf16.mxu1 %vm1855_vm1, %v1854_v2  ;;  %1586 = vmatpush3.bf16.msra.mxu1 %v1703_v32 }
 0x404   : > { %v831_v27 = vpack.c.bf16 %v827_v26, %v827_v26  ;;  %1587 = vmatprep.subr.bf16.mxu1 %v1854_v2 }
 0x406   : > { %1582 = vmatmul.mubr.msk.bf16.vlgmr.msra.gmra.mxu0 %vm590_vm3, %v831_v27 }
 0x407   : > { %1597 = vmatprep.mubr.msk.bf16.mxu0 %vm1855_vm1, %v1854_v2  ;;  %1588 = vmatpush3.bf16.msra.mxu1 %v1704_v33 }
 0x408   : > { %1601 = vmatprep.subr.bf16.mxu1 %v1854_v2  ;;  %1594 = vmatpush3.bf16.msra.mxu0 %v1705_v34 }
 0x409   : > { %1595 = vmatprep.subr.bf16.mxu0 %v1854_v2 }
 0x40c   : > { %1596 = vmatpush3.bf16.msra.mxu0 %v1706_v54 }
 0x45a   : > { %v875_v28 = vpop.f32.mrf.mxu1 }
 0x45c   : > { %v1565_v29 = vpop.f32.mrf.mxu1 }
 0x45e   : > { %v878_v30 = vpop.f32.mrf.mxu1 }
 0x460   : > { %v1566_v31 = vpop.f32.mrf.mxu1 }
 0x4be   : > { %v923_v35 = vpop.f32.mrf.mxu0 }
 0x4bf   : > { %1026 = vrot.lane.b32.xlu1 %v923_v35, %s1861_s20 }
 0x4c0   : > { %v1571_v36 = vpop.f32.mrf.mxu0 }
 0x4c2   : > { %v926_v37 = vpop.f32.mrf.mxu0  ;;  %v971_v38 = vpop.f32.mrf.mxu1 }
 0x4c3   : > { %1030 = vrot.lane.b32.xlu0 %v971_v38, %s1862_s25 }
 0x4c4   : > { %v1572_v39 = vpop.f32.mrf.mxu0  ;;  %v1577_v40 = vpop.f32.mrf.mxu1 }
 0x4c6   : > { %v974_v41 = vpop.f32.mrf.mxu1  ;;  %v1019_v42 = vpop.f32.mrf.mxu0 }
 0x4c7   : > { %1034 = vrot.lane.b32.xlu1 %v1019_v42, %s1863_s0 }
 0x4c8   : > { %v1578_v43 = vpop.f32.mrf.mxu1  ;;  %v1583_v44 = vpop.f32.mrf.mxu0 }
 0x4ca   : > { %v1022_v45 = vpop.f32.mrf.mxu0 }
 0x4cc   : > { %v1584_v46 = vpop.f32.mrf.mxu0 }
 0x531   : > { %v1027_v47 = vpop.permute.xlu1 %1026 }
 0x532   : > { %v1037_v49 = vsel %vm590_vm3, %v875_v28, %v1027_v47 }
 0x535   : > { %v1031_v48 = vpop.permute.xlu0 %1030 }
 0x536   : > { %v1039_v50 = vsel %vm1038_vm5, %v1037_v49, %v1031_v48 }
 0x539   : > { %v1035_v51 = vpop.permute.xlu1 %1034 }
 0x53a   : > { %v1041_v52 = vsel %vm1040_vm6, %v1039_v50, %v1035_v51 }
 0x53b   : > { %v1042_v53 = vpack.c.bf16 %v1041_v52, %v1041_v52 }
 0x53d   : > { %1590 = vmatmul.mubr.msk.bf16.vlgmr.msra.gmra.mxu1 %vm529_vm2, %v1042_v53 }
 0x53e   : > { %1609 = vmatprep.mubr.msk.bf16.mxu1 %vm1855_vm1, %v1854_v2  ;;  %1602 = vmatpush3.bf16.msra.mxu1 %v1707_v55 }
 0x53f   : > { %1603 = vmatprep.subr.bf16.mxu1 %v1854_v2 }
 0x542   : > { %1604 = vmatpush3.bf16.msra.mxu1 %v1708_v56 }
 0x543   : > { %1605 = vmatprep.subr.bf16.mxu1 %v1854_v2 }
 0x546   : > { %1606 = vmatpush3.bf16.msra.mxu1 %v1709_v0 }
 0x547   : > { %1607 = vmatprep.subr.bf16.mxu1 %v1854_v2  ;;  %v1484_v2 = vld [vmem:[%s495_s15] ss:$0 sm:$0xff] }
 0x54a   : > { %1608 = vmatpush3.bf16.msra.mxu1 %v1710_v1 }
 0x5fd   : > { %v1103_v58 = vpop.f32.mrf.mxu1 }
 0x5fe   : > { %v1104_v59 = vadd.f32 %v1476_v57, %v1103_v58 }
 0x5ff   : > { %v1591_v60 = vpop.f32.mrf.mxu1 }
 0x600   : > { %v1109_v61 = vpack.c.bf16 %v1104_v59, %v1104_v59 }
 0x601   : > { %v1106_v62 = vpop.f32.mrf.mxu1 }
 0x602   : > { %1598 = vmatmul.mubr.msk.bf16.vlgmr.msra.gmra.mxu0 %vm529_vm2, %v1109_v61 }
 0x603   : > { %v1592_v63 = vpop.f32.mrf.mxu1 }
 0x6c2   : > { %v1170_v4 = vpop.f32.mrf.mxu0 }
 0x6c3   : > { %v1171_v5 = vadd.f32 %v1480_v3, %v1170_v4 }
 0x6c4   : > { %v1599_v6 = vpop.f32.mrf.mxu0 }
 0x6c5   : > { %v1176_v7 = vmax.f32 %v1171_v5, 0.0 }
 0x6c6   : > { %v1173_v8 = vpop.f32.mrf.mxu0 }
 0x6c7   : > { %v1177_v9 = vpack.c.bf16 %v1176_v7, %v1176_v7 }
 0x6c8   : > { %v1600_v10 = vpop.f32.mrf.mxu0 }
 0x6c9   : > { %1610 = vmatmul.mubr.msk.bf16.vlgmr.msra.gmra.mxu1 %vm1217_vm7, %v1177_v9 }
 0x789   : > { %v1255_v11 = vpop.f32.mrf.mxu1 }
 0x78a   : > { %v1256_v12 = vadd.f32 %v1484_v2, %v1255_v11 }
 0x78b   : > { %v1611_v13 = vpop.f32.mrf.mxu1  ;;  %1265 = sbr.rel (%p1490_p11) target bundleno = 1937 (0x791), region = 68 }
 0x78c   : > { %1261 = vst.msk [vmem:[#allocation2] sm:$0xff] %vm529_vm2, %v1256_v12 }
 0x78d   : > { %v1258_v14 = vpop.f32.mrf.mxu1 }
 0x78f   : > { %v1612_v15 = vpop.f32.mrf.mxu1 }
 0x790   : > { %1266 = vst.msk [vmem:[%s2062_s28] sm:$0xff] %vm529_vm2, %v1256_v12 }
 0x791 PF: > { %s1492_s9 = sshll.u32 %s1839_s13, 7  ;;  %s2275_s15 = sld [smem:[#allocation22_spill]] }
 0x792   : > { %s1281_s26 = sshll.u32 %s2062_s28, 4  ;;  %s1268_s27 = scalar_lea.sflag [#allocation5], %s2014_s22  ;;  %s1282_s26 = int_to_ptr.vmem [resolvable:$true] %s1281_s26 }
 0x793   : > { %s1755_s18 = scalar_lea.vmem %s1282_s26, 128  ;;  %s1864_s12 = smov [#allocation6]  }
 0x794   : > { %p1756_p1 = scmp.ne.s32.totalorder %s1282_s26, %s1755_s18  ;;  %s1759_s14 = sshll.u32 %s1864_s12, 4  ;;  %s1760_s14 = int_to_ptr.vmem [resolvable:$false] %s1759_s14 }
 0x795   : > { %s1761_s23 = scalar_lea.vmem %s1760_s14, 256  ;;  %p1762_p5 = scmp.lt.s32.totalorder %s1282_s26, %s1760_s14 }
 0x796   : > { %p1757_p2 = pnand %p1756_p1, %p1978_p10  ;;  %p1763_p6 = scmp.lt.s32.totalorder %s1761_s23, %s1755_s18 }
 0x797   : > { %s2276_s3 = smov %s2275_s15  ;;  %s1279_s10 = scalar_lea.hbm %s2275_s15, %s1492_s9 }
 0x798   : > { %p1758_p4 = pneg %p1757_p2  ;;  %p1764_p7 = por %p1763_p6, %p1762_p5 }
 0x79a   : > { %p1765_p8 = pnand %p1764_p7, %p1758_p4 }
 0x79c   : > { %1768 = shalt.err (!%p1765_p8)
}
 0x79d   : > { %s1769_s13 = scalar_lea.hbm %s1279_s10, 128  ;;  %s1773_s20 = scalar_lea.hbm %s2276_s3, 256 }
 0x79e   : > { %p1770_p12 = scmp.ne.s32.totalorder %s1279_s10, %s1769_s13  ;;  %p1774_p0 = scmp.lt.s32.totalorder %s1279_s10, %s2276_s3 }
 0x79f   : > { %p1775_p9 = scmp.lt.s32.totalorder %s1773_s20, %s1769_s13 }
 0x7a0   : > { %p1771_p3 = pnand %p1770_p12, %p1978_p10 }
 0x7a1   : > { %p1776_p11 = por %p1775_p9, %p1774_p0 }
 0x7a2   : > { %p1772_p13 = pneg %p1771_p3 }
 0x7a4   : > { %p1777_p1 = pnand %p1776_p11, %p1772_p13 }
 0x7a6   : > { %1780 = shalt.err (!%p1777_p1)
}
 0x7a7   : > { %1615 = dma.vmem_to_hbm [thread:$0]  (%p1978_p10), %s1282_s26, 128, %s1279_s10, %s1268_s27  }
 0x7a8 PF: > { %s2277_s19 = sld [smem:[#allocation14_spill]] }
 0x7a9   : > { %s2278_s17 = sld [smem:[#allocation9_spill]] }
 0x7aa   : > { %s2279_s16 = sld [smem:[#allocation17_spill]] }
 0x7ae   : > { %p1626_p2 = scmp.ge.s32.totalorder %s2277_s19, 2 }
 0x7af   : > { %s1293_s29 = sand.u32 1, %s2278_s17  }
 0x7b0   : > { %p2280_p4 = scmp.ne.s32.totalorder %s2279_s16, 0  ;;  %s1294_s11 = scalar_lea.sflag [#allocation5], %s1293_s29 }
 0x7b2   : > { %p1622_p5 = pnand %p1626_p2, %p2280_p4 }
 0x7b4   : > { %p1623_p6 = pneg %p1622_p5 }
 0x7b6   : > { %1818 = dma.done.wait (%p1623_p6), %s1294_s11, 128  }
 0x7b7   : > { %1820 = vsyncadd (%p1623_p6), %s1294_s11, 4294967168  ;;  %s25_s16 = sadd.s32 1, %s2277_s19   ;;  %s2281_s30 = sld [smem:[#allocation10_spill]] }
 0x7b8   : > { %p22_p7 = scmp.ge.s32.totalorder %s25_s16, 6   ;;  %s2282_s10 = sld [smem:[#allocation11_spill]] }
 0x7b9   : > { %s2283_s11 = sld [smem:[#allocation18_spill]] }
 0x7ba   : > { %s2284_s12 = sld [smem:[#allocation12_spill]]  ;;  %24 = sbr.rel (!%p22_p7) target bundleno = 12 (0xc), region = 133 }
 0x7bb   : > { %s2285_s13 = sld [smem:[#allocation13_spill]] }
 0x7bc   : > { %s2286_s14 = sld [smem:[#allocation15_spill]] }
 0x7bd   : > { %s2287_s15 = sld [smem:[#allocation16_spill]] }
 0x7bf   :  { %1299 = vsyncpa [#allocation4], 1 }
 0x7c0   :  { %1301 = vsyncpa [#allocation4 + $0x1], 1 }
 0x7c1   :  { %1302 = vsyncpa [#allocation5], 1 }
 0x7c2   :  { %1304 = vsyncpa [#allocation5 + $0x1], 1 }

</bundles_post_ra>
